<compile_context>
chip_gen: v6e
topology: v6e:2x2x1
jax: 0.10.0
libtpu: 0.0.40
codegen_flags: <defaults>
</compile_context>

<pallas_src>
import math
import jax
import jax.numpy as jnp
from jax.experimental import pallas as pl
from jax.experimental.pallas import tpu as pltpu

# ------------------------- small synthetic config --------------------------
IN_CHANNELS = 4                  # stands in for 2048
POOLER_RESOLUTION = 4            # stands in for 7
POOLER_SCALES = (0.25, 0.125)    # two FPN levels
SAMPLING_RATIO = 2
HIDDEN_DIM = 32                  # stands in for 2048 (first Linear out)
OUT_CHANNELS = 64                # stands in for 4096 (self.out_channels)


# =========================== Pooler (plain JAX glue) ========================
def _map_levels(boxes, k_min, k_max, canonical_scale=224.0, canonical_level=4.0, eps=1e-6):
    """maskrcnn-benchmark LevelMapper: FPN paper eqn (1)."""
    areas = (boxes[:, 2] - boxes[:, 0]) * (boxes[:, 3] - boxes[:, 1])
    s = jnp.sqrt(jnp.maximum(areas, 0.0))
    target = jnp.floor(canonical_level + jnp.log2(s / canonical_scale + eps))
    target = jnp.clip(target, k_min, k_max)
    return (target - k_min).astype(jnp.int32)


def pooler(features, proposals, scales, resolution, sampling_ratio):
    """Multi-level ROIAlign (aligned=False, maskrcnn-benchmark semantics).

    features: list of (B, C, H_l, W_l) f32; proposals: list of (n_i, 4) boxes per image.
    All FPN levels are flattened channel-last into one pixel table (no padding to the
    largest level) and the 4 bilinear corners of every sample of every ROI are fetched
    with a SINGLE fused gather -- only 4*C*P^2 samples per ROI touch HBM.
    Returns (K, C, resolution, resolution)."""
    L = len(features)
    B, C = features[0].shape[:2]
    boxes = jnp.concatenate(proposals, axis=0)
    b_idx = jnp.concatenate(
        [jnp.full((p.shape[0],), i, jnp.int32) for i, p in enumerate(proposals)])
    K = boxes.shape[0]

    Hs_py = [int(f.shape[2]) for f in features]
    Ws_py = [int(f.shape[3]) for f in features]
    Hs = jnp.array(Hs_py, jnp.int32)
    Ws = jnp.array(Ws_py, jnp.int32)
    scales_arr = jnp.array(scales, jnp.float32)

    # One channel-last pixel table: row r = feature vector of one (level, image, y, x).
    # TODO(synk): for very large feature maps this could become a Pallas ROIAlign kernel
    # (levels/b_idx via scalar prefetch, features in HBM via memory_space=pl.ANY).
    flat_all = jnp.concatenate(
        [jnp.transpose(f, (0, 2, 3, 1)).reshape(B * h * w, C)
         for f, h, w in zip(features, Hs_py, Ws_py)], axis=0)          # (sum_l B*H_l*W_l, C)
    level_base = jnp.array(
        [sum(B * Hs_py[j] * Ws_py[j] for j in range(l)) for l in range(L)], jnp.int32)

    if L == 1:
        levels = jnp.zeros((K,), jnp.int32)
    else:
        k_min = -math.log2(scales[0])
        k_max = -math.log2(scales[-1])
        levels = _map_levels(boxes, k_min, k_max)

    Hi = Hs[levels][:, None]                                  # (K, 1) int
    Wi = Ws[levels][:, None]
    Hf = Hi.astype(jnp.float32)
    Wf = Wi.astype(jnp.float32)
    roi_base = (level_base[levels] + b_idx * Hs[levels] * Ws[levels])[:, None]   # (K, 1)

    scale_k = scales_arr[levels]                              # (K,)
    x1 = boxes[:, 0] * scale_k
    y1 = boxes[:, 1] * scale_k
    x2 = boxes[:, 2] * scale_k
    y2 = boxes[:, 3] * scale_k
    roi_w = jnp.maximum(x2 - x1, 1.0)
    roi_h = jnp.maximum(y2 - y1, 1.0)
    bin_w = roi_w / resolution
    bin_h = roi_h / resolution

    sr = sampling_ratio
    ph = jnp.arange(resolution, dtype=jnp.float32)
    iy = jnp.arange(sr, dtype=jnp.float32)
    ys = (y1[:, None, None] + ph[None, :, None] * bin_h[:, None, None]
          + (iy[None, None, :] + 0.5) * bin_h[:, None, None] / sr).reshape(K, -1)
    xs = (x1[:, None, None] + ph[None, :, None] * bin_w[:, None, None]
          + (iy[None, None, :] + 0.5) * bin_w[:, None, None] / sr).reshape(K, -1)
    P = resolution * sr
    y_grid = jnp.broadcast_to(ys[:, :, None], (K, P, P)).reshape(K, P * P)
    x_grid = jnp.broadcast_to(xs[:, None, :], (K, P, P)).reshape(K, P * P)

    # maskrcnn-benchmark skips a sample only when y < -1 or y > H (inclusive bounds kept).
    valid = (y_grid >= -1.0) & (y_grid <= Hf) & (x_grid >= -1.0) & (x_grid <= Wf)
    yc = jnp.maximum(y_grid, 0.0)
    xc = jnp.maximum(x_grid, 0.0)
    y_low = jnp.minimum(jnp.floor(yc).astype(jnp.int32), Hi - 1)
    x_low = jnp.minimum(jnp.floor(xc).astype(jnp.int32), Wi - 1)
    y_high = jnp.minimum(y_low + 1, Hi - 1)
    x_high = jnp.minimum(x_low + 1, Wi - 1)
    ly = jnp.where(y_low >= Hi - 1, 0.0, yc - y_low.astype(jnp.float32))
    lx = jnp.where(x_low >= Wi - 1, 0.0, xc - x_low.astype(jnp.float32))
    hy = 1.0 - ly
    hx = 1.0 - lx

    # Single fused gather of all 4 bilinear corners for all samples of all ROIs.
    idx4 = jnp.stack([roi_base + y_low * Wi + x_low,
                      roi_base + y_low * Wi + x_high,
                      roi_base + y_high * Wi + x_low,
                      roi_base + y_high * Wi + x_high], axis=1)        # (K, 4, P*P)
    vals4 = flat_all[idx4.reshape(K, 4 * P * P)].reshape(K, 4, P * P, C)
    w4 = jnp.stack([hy * hx, hy * lx, ly * hx, ly * lx], axis=1)       # (K, 4, P*P)
    vals = (w4[..., None] * vals4).sum(axis=1)                         # (K, P*P, C)
    vals = vals * valid[:, :, None].astype(vals.dtype)
    vals = vals.reshape(K, resolution, sr, resolution, sr, C).mean(axis=(2, 4))
    return jnp.transpose(vals, (0, 3, 1, 2))                           # (K, C, R, R)


# ============== fused Linear+ReLU -> Linear+ReLU Pallas kernel ==============
_LANE = 128


def _round_up(n, m):
    return ((n + m - 1) // m) * m


def _tpu_tuning():
    """Per-generation tile sizes and VMEM budget (conservative fallbacks)."""
    vmem = None
    try:
        vmem = int(pltpu.get_tpu_info().vmem_capacity_bytes)
    except Exception:
        vmem = None
    kind = ""
    try:
        kind = jax.devices()[0].device_kind.lower()
    except Exception:
        kind = ""
    two_cores = "7" in kind                      # v7x: 2 TensorCores per chip
    if vmem is None:
        vmem = (64 << 20) if two_cores else (128 << 20)
    if vmem >= (128 << 20):                      # v5e / v6e: 128 MiB physical VMEM
        max_tm, max_tk = 512, 2048
    else:                                        # v7x: 64 MiB per TensorCore
        max_tm, max_tk = 512, 1024
    vmem_limit = min(100 << 20, (vmem * 3) // 4)   # 96 MiB on v5e/v6e, 48 MiB on v7x
    return max_tm, max_tk, vmem_limit, two_cores


def _mlp_kernel(x_ref, w6_ref, b6_ref, w7_ref, b7_ref, o_ref, acc_ref):
    d_step = pl.program_id(1)

    @pl.when(d_step == 0)
    def _():
        acc_ref[...] = jnp.zeros_like(acc_ref)

    # fc6 partial accumulate: bf16 MXU operands, f32 accumulate.
    acc_ref[...] += jnp.dot(x_ref[...], w6_ref[...],
                            preferred_element_type=jnp.float32)

    @pl.when(d_step == pl.num_programs(1) - 1)
    def _():
        h = jnp.maximum(acc_ref[...] + b6_ref[...], 0.0)          # relu(fc6(x)), f32
        y = jnp.dot(h.astype(jnp.bfloat16), w7_ref[...],
                    preferred_element_type=jnp.float32) + b7_ref[...]
        o_ref[...] = jnp.maximum(y, 0.0).astype(o_ref.dtype)      # relu(fc7(h))


def _build_mlp_call(K, Hp, Op, tm, tk, n_k, n_d, vmem_limit, flops, bytes_accessed,
                    single_buffer_residents):
    # Resident operands (constant index_map): single-buffer them so their VMEM
    # footprint is not doubled (key at production shapes, esp. v7x 64 MiB VMEM).
    if single_buffer_residents:
        resident = dict(pipeline_mode=pl.Buffered(1))
    else:
        resident = {}
    in_specs = [
        pl.BlockSpec((tm, tk), lambda i, j: (i, j)),                  # x tile (pipelined)
        pl.BlockSpec((tk, Hp), lambda i, j: (j, 0)),                  # w6 tile (pipelined)
        pl.BlockSpec((1, Hp), lambda i, j: (0, 0), **resident),       # b6 (resident)
        pl.BlockSpec((Hp, Op), lambda i, j: (0, 0), **resident),      # w7 (resident)
        pl.BlockSpec((1, Op), lambda i, j: (0, 0), **resident),       # b7 (resident)
    ]
    return pl.pallas_call(
        _mlp_kernel,
        out_shape=jax.ShapeDtypeStruct((K, Op), jnp.float32),
        grid_spec=pltpu.PrefetchScalarGridSpec(
            num_scalar_prefetch=0,
            grid=(n_k, n_d),                                          # reduction axis last
            in_specs=in_specs,
            out_specs=pl.BlockSpec((tm, Op), lambda i, j: (i, 0)),    # lane-dense output
            scratch_shapes=[pltpu.VMEM((tm, Hp), jnp.float32)],       # fc6 accumulator
        ),
        compiler_params=pltpu.CompilerParams(
            dimension_semantics=("parallel", "arbitrary"),            # K shards across TCs
            vmem_limit_bytes=vmem_limit,
        ),
        cost_estimate=pl.CostEstimate(flops=flops, transcendentals=0,
                                      bytes_accessed=bytes_accessed),
    )


def fused_two_fc_relu(x, w6, b6, w7, b7):
    """y = relu(relu(x @ w6 + b6) @ w7 + b7); weights stored as (in, out)."""
    K, D = x.shape
    H = w6.shape[1]
    O = w7.shape[1]
    Hp = _round_up(H, _LANE)      # lane-dense hidden dim
    Op = _round_up(O, _LANE)      # lane-dense output dim (unmasked vst)

    max_tm, max_tk, vmem_limit, two_cores = _tpu_tuning()

    # Lane-dense zero padding on the (small) parameters only, never on x.  Padded
    # hidden/output columns stay exactly 0 through both ReLUs and are sliced off.
    w6p = jnp.zeros((D, Hp), jnp.bfloat16).at[:, :H].set(w6.astype(jnp.bfloat16))
    b6p = jnp.zeros((1, Hp), jnp.float32).at[:, :H].set(b6)
    w7p = jnp.zeros((Hp, Op), jnp.bfloat16).at[:H, :O].set(w7.astype(jnp.bfloat16))
    b7p = jnp.zeros((1, Op), jnp.float32).at[:, :O].set(b7)

    xb = x.astype(jnp.bfloat16)   # bf16 MXU operand (halves HBM/VMEM traffic)

    # K tiling: multiple of 16 rows (bf16 packs 16 rows per sublane tile); on 2-TC
    # parts split K into at least two tiles so both cores get work.  The ragged last
    # tile is handled by Pallas (OOB rows never stored) -- no host-side padding of x.
    if two_cores and K > 16:
        tm = min(max_tm, _round_up(pl.cdiv(K, 2), 16))
    else:
        tm = min(max_tm, _round_up(K, 16))
    n_k = pl.cdiv(K, tm)

    # D (contraction) tiling: whole slab when small, else max_tk-wide chunks.
    tk = D if D <= max_tk else max_tk
    Dp = _round_up(D, tk)
    if Dp != D:
        # zero-pad the contraction dim (zeros contribute nothing to the sum)
        xb = jnp.pad(xb, ((0, 0), (0, Dp - D)))
        w6p = jnp.pad(w6p, ((0, Dp - D), (0, 0)))
    n_d = Dp // tk

    flops = 2 * K * D * H + 2 * K * H * O
    bytes_accessed = (K * Dp * 2            # x streamed once
                      + n_k * Dp * Hp * 2   # w6 re-streamed once per K tile
                      + Hp * Op * 2         # w7 resident
                      + (Hp + Op) * 4       # biases
                      + K * Op * 4)         # output writeback

    args = (xb, w6p, b6p, w7p, b7p)
    try:
        out = _build_mlp_call(K, Hp, Op, tm, tk, n_k, n_d, vmem_limit,
                              flops, bytes_accessed,
                              single_buffer_residents=True)(*args)
    except Exception:
        # TODO(synk): pl.Buffered(1) not supported on this jax build; residents fall
        # back to default double-buffering (extra VMEM at production shapes only).
        out = _build_mlp_call(K, Hp, Op, tm, tk, n_k, n_d, vmem_limit,
                              flops, bytes_accessed,
                              single_buffer_residents=False)(*args)
    return out[:, :O]


# ============================ parameter init ================================
def make_fc_params(key, in_dim, out_dim):
    # _initialize_weights: normal_(weight, 0, 0.01), constant_(bias, 0)
    w = 0.01 * jax.random.normal(key, (in_dim, out_dim), jnp.float32)
    b = jnp.zeros((out_dim,), jnp.float32)
    return w, b


def roi_feature_extractor_forward(features, proposals, params):
    """ResNet101Conv5ROIFeatureExtractor.forward (eval):
       pooled = pooler(x, proposals); y = classifier(flatten(pooled, 1)); return (y, pooled)."""
    (w6, b6), (w7, b7) = params
    pooled = pooler(features, proposals, POOLER_SCALES, POOLER_RESOLUTION, SAMPLING_RATIO)
    flat = pooled.reshape(pooled.shape[0], -1)                # torch.flatten(pooled, 1)
    # TODO(synk): nn.Dropout layers are identity at inference; train-mode dropout and the
    # auxiliary DropBlock2D / noise_pool / flip_pool methods are not part of forward().
    y = fused_two_fc_relu(flat, w6, b6, w7, b7)
    return y, pooled


# ================================== main ====================================
if __name__ == "__main__":
    key = jax.random.PRNGKey(0)
    kf1, kf2, kb, kw1, kw2 = jax.random.split(key, 5)

    B = 2
    IMG = 64.0   # image size in the coordinate frame of the proposals
    # two FPN levels (1/4 and 1/8 of the 64x64 image)
    features = [jax.random.normal(kf1, (B, IN_CHANNELS, 16, 16), jnp.float32),
                jax.random.normal(kf2, (B, IN_CHANNELS, 8, 8), jnp.float32)]

    # proposals: list of per-image boxes [x1, y1, x2, y2] in image coordinates
    nboxes = [3, 5]
    kb_imgs = jax.random.split(kb, B)
    proposals = []
    for i, n in enumerate(nboxes):
        pts = jax.random.uniform(kb_imgs[i], (n, 4), jnp.float32, 0.0, IMG)
        bx1 = jnp.minimum(pts[:, 0], pts[:, 2])
        bx2 = jnp.maximum(pts[:, 0], pts[:, 2])
        by1 = jnp.minimum(pts[:, 1], pts[:, 3])
        by2 = jnp.maximum(pts[:, 1], pts[:, 3])
        proposals.append(jnp.stack([bx1, by1, bx2, by2], axis=1))

    input_size = IN_CHANNELS * POOLER_RESOLUTION ** 2
    params = (make_fc_params(kw1, input_size, HIDDEN_DIM),
              make_fc_params(kw2, HIDDEN_DIM, OUT_CHANNELS))

    feats, pooled = roi_feature_extractor_forward(features, proposals, params)
    jax.block_until_ready((feats, pooled))

    K = sum(nboxes)
    assert feats.shape == (K, OUT_CHANNELS)
    assert pooled.shape == (K, IN_CHANNELS, POOLER_RESOLUTION, POOLER_RESOLUTION)
    assert bool(jnp.all(feats >= 0.0))   # ReLU output
    print("KERNEL_OK")
</pallas_src>

<mosaic_0001>
module attributes {stable_mosaic.version = 11 : i64} {
  func.func @_mlp_kernel(%arg0: i32, %arg1: i32, %arg2: memref<16x64xbf16, #tpu.memory_space<vmem>>, %arg3: memref<64x128xbf16, #tpu.memory_space<vmem>>, %arg4: memref<1x128xf32, #tpu.memory_space<vmem>>, %arg5: memref<128x128xbf16, #tpu.memory_space<vmem>>, %arg6: memref<1x128xf32, #tpu.memory_space<vmem>>, %arg7: memref<16x128xf32, #tpu.memory_space<vmem>>, %arg8: memref<16x128xf32, #tpu.memory_space<vmem>>) attributes {dimension_semantics = [#tpu.dimension_semantics<parallel>, #tpu.dimension_semantics<arbitrary>], iteration_bounds = array<i64: 1, 1>, scalar_prefetch = 0 : i64, scratch_operands = 1 : i64, tpu.core_type = #tpu.core_type<tc>, window_params = [{transform_indices = @transform_0, window_bounds = array<i64: 16, 64>}, {transform_indices = @transform_1, window_bounds = array<i64: 64, 128>}, {pipeline_mode = #tpu.pipeline_mode<synchronous>, transform_indices = @transform_2, window_bounds = array<i64: 1, 128>}, {pipeline_mode = #tpu.pipeline_mode<synchronous>, transform_indices = @transform_3, window_bounds = array<i64: 128, 128>}, {pipeline_mode = #tpu.pipeline_mode<synchronous>, transform_indices = @transform_4, window_bounds = array<i64: 1, 128>}, {transform_indices = @transform_5, window_bounds = array<i64: 16, 128>}]} {
    %c0_i32 = arith.constant 0 : i32
    %0 = arith.cmpi eq, %arg1, %c0_i32 : i32
    %1 = arith.extui %0 : i1 to i32
    %c0_i32_0 = arith.constant 0 : i32
    %2 = arith.cmpi ne, %1, %c0_i32_0 : i32
    scf.if %2 {
      %cst_10 = arith.constant 0.000000e+00 : f32
      %12 = vector.broadcast %cst_10 : f32 to vector<16x128xf32>
      %c0_11 = arith.constant 0 : index
      %c0_12 = arith.constant 0 : index
      %13 = vector.load %arg8[%c0_11, %c0_12] : memref<16x128xf32, #tpu.memory_space<vmem>>, vector<16x128xf32>
      tpu.vector_store %arg8[%c0_11, %c0_12], %12 {strides = array<i32>} : memref<16x128xf32, #tpu.memory_space<vmem>>, vector<16x128xf32>,
    } else {
    }
    %c0 = arith.constant 0 : index
    %c0_1 = arith.constant 0 : index
    %3 = vector.load %arg8[%c0, %c0_1] : memref<16x128xf32, #tpu.memory_space<vmem>>, vector<16x128xf32>
    %c0_2 = arith.constant 0 : index
    %c0_3 = arith.constant 0 : index
    %4 = vector.load %arg2[%c0_2, %c0_3] : memref<16x64xbf16, #tpu.memory_space<vmem>>, vector<16x64xbf16>
    %c0_4 = arith.constant 0 : index
    %c0_5 = arith.constant 0 : index
    %5 = vector.load %arg3[%c0_4, %c0_5] : memref<64x128xbf16, #tpu.memory_space<vmem>>, vector<64x128xbf16>
    %cst = arith.constant dense<0.000000e+00> : vector<16x128xf32>
    %6 = tpu.matmul %4, %5, %cst {dimension_numbers = #tpu.dot_dimension_numbers<[1], [0], [0], [1], [0, 0, 1, 1], [], []>} : vector<16x64xbf16>, vector<64x128xbf16>, vector<16x128xf32> -> vector<16x128xf32>
    %7 = arith.addf %3, %6 : vector<16x128xf32>
    %c0_6 = arith.constant 0 : index
    %c0_7 = arith.constant 0 : index
    %8 = vector.load %arg8[%c0_6, %c0_7] : memref<16x128xf32, #tpu.memory_space<vmem>>, vector<16x128xf32>
    tpu.vector_store %arg8[%c0_6, %c0_7], %7 {strides = array<i32>} : memref<16x128xf32, #tpu.memory_space<vmem>>, vector<16x128xf32>,
    %c0_i32_8 = arith.constant 0 : i32
    %9 = arith.cmpi eq, %arg1, %c0_i32_8 : i32
    %10 = arith.extui %9 : i1 to i32
    %c0_i32_9 = arith.constant 0 : i32
    %11 = arith.cmpi ne, %10, %c0_i32_9 : i32
    scf.if %11 {
      %c0_10 = arith.constant 0 : index
      %c0_11 = arith.constant 0 : index
      %12 = vector.load %arg8[%c0_10, %c0_11] : memref<16x128xf32, #tpu.memory_space<vmem>>, vector<16x128xf32>
      %c0_12 = arith.constant 0 : index
      %c0_13 = arith.constant 0 : index
      %13 = vector.load %arg4[%c0_12, %c0_13] : memref<1x128xf32, #tpu.memory_space<vmem>>, vector<1x128xf32>
      %14 = vector.broadcast %13 : vector<1x128xf32> to vector<16x128xf32>
      %15 = arith.addf %12, %14 : vector<16x128xf32>
      %cst_14 = arith.constant 0.000000e+00 : f32
      %16 = vector.broadcast %cst_14 : f32 to vector<16x128xf32>
      %17 = arith.maximumf %15, %16 : vector<16x128xf32>
      %18 = arith.truncf %17 : vector<16x128xf32> to vector<16x128xbf16>
      %c0_15 = arith.constant 0 : index
      %c0_16 = arith.constant 0 : index
      %19 = vector.load %arg5[%c0_15, %c0_16] : memref<128x128xbf16, #tpu.memory_space<vmem>>, vector<128x128xbf16>
      %cst_17 = arith.constant dense<0.000000e+00> : vector<16x128xf32>
      %20 = tpu.matmul %18, %19, %cst_17 {dimension_numbers = #tpu.dot_dimension_numbers<[1], [0], [0], [1], [0, 0, 1, 1], [], []>} : vector<16x128xbf16>, vector<128x128xbf16>, vector<16x128xf32> -> vector<16x128xf32>
      %c0_18 = arith.constant 0 : index
      %c0_19 = arith.constant 0 : index
      %21 = vector.load %arg6[%c0_18, %c0_19] : memref<1x128xf32, #tpu.memory_space<vmem>>, vector<1x128xf32>
      %22 = vector.broadcast %21 : vector<1x128xf32> to vector<16x128xf32>
      %23 = arith.addf %20, %22 : vector<16x128xf32>
      %cst_20 = arith.constant 0.000000e+00 : f32
      %24 = vector.broadcast %cst_20 : f32 to vector<16x128xf32>
      %25 = arith.maximumf %23, %24 : vector<16x128xf32>
      %c0_21 = arith.constant 0 : index
      %c0_22 = arith.constant 0 : index
      %26 = vector.load %arg7[%c0_21, %c0_22] : memref<16x128xf32, #tpu.memory_space<vmem>>, vector<16x128xf32>
      tpu.vector_store %arg7[%c0_21, %c0_22], %25 {strides = array<i32>} : memref<16x128xf32, #tpu.memory_space<vmem>>, vector<16x128xf32>,
    } else {
    }
    return
  }
  func.func @transform_0(%arg0: i32, %arg1: i32) -> (i32, i32) {
    %c0_i32 = arith.constant 0 : i32
    return %arg0, %arg1 : i32, i32
  }
  func.func @transform_1(%arg0: i32, %arg1: i32) -> (i32, i32) {
    %c0_i32 = arith.constant 0 : i32
    %c0_i32_0 = arith.constant 0 : i32
    return %arg1, %c0_i32 : i32, i32
  }
  func.func @transform_2(%arg0: i32, %arg1: i32) -> (i32, i32) {
    %c0_i32 = arith.constant 0 : i32
    %c0_i32_0 = arith.constant 0 : i32
    %c0_i32_1 = arith.constant 0 : i32
    return %c0_i32, %c0_i32_0 : i32, i32
  }
  func.func @transform_3(%arg0: i32, %arg1: i32) -> (i32, i32) {
    %c0_i32 = arith.constant 0 : i32
    %c0_i32_0 = arith.constant 0 : i32
    %c0_i32_1 = arith.constant 0 : i32
    return %c0_i32, %c0_i32_0 : i32, i32
  }
  func.func @transform_4(%arg0: i32, %arg1: i32) -> (i32, i32) {
    %c0_i32 = arith.constant 0 : i32
    %c0_i32_0 = arith.constant 0 : i32
    %c0_i32_1 = arith.constant 0 : i32
    return %c0_i32, %c0_i32_0 : i32, i32
  }
  func.func @transform_5(%arg0: i32, %arg1: i32) -> (i32, i32) {
    %c0_i32 = arith.constant 0 : i32
    %c0_i32_0 = arith.constant 0 : i32
    return %arg0, %c0_i32 : i32, i32
  }
}

module attributes {stable_mosaic.version = 11 : i64} {
  func.func @_mlp_kernel(%arg0: i32, %arg1: i32, %arg2: memref<16x64xbf16, #tpu.memory_space<vmem>>, %arg3: memref<64x128xbf16, #tpu.memory_space<vmem>>, %arg4: memref<1x128xf32, #tpu.memory_space<vmem>>, %arg5: memref<128x128xbf16, #tpu.memory_space<vmem>>, %arg6: memref<1x128xf32, #tpu.memory_space<vmem>>, %arg7: memref<16x128xf32, #tpu.memory_space<vmem>>, %arg8: memref<16x128xf32, #tpu.memory_space<vmem>>) attributes {dimension_semantics = [#tpu.dimension_semantics<parallel>, #tpu.dimension_semantics<arbitrary>], iteration_bounds = array<i64: 1, 1>, scalar_prefetch = 0 : i64, scratch_operands = 1 : i64, tpu.core_type = #tpu.core_type<tc>, window_params = [{transform_indices = @transform_0, window_bounds = array<i64: 16, 64>}, {transform_indices = @transform_1, window_bounds = array<i64: 64, 128>}, {pipeline_mode = #tpu.pipeline_mode<synchronous>, transform_indices = @transform_2, window_bounds = array<i64: 1, 128>}, {pipeline_mode = #tpu.pipeline_mode<synchronous>, transform_indices = @transform_3, window_bounds = array<i64: 128, 128>}, {pipeline_mode = #tpu.pipeline_mode<synchronous>, transform_indices = @transform_4, window_bounds = array<i64: 1, 128>}, {transform_indices = @transform_5, window_bounds = array<i64: 16, 128>}]} {
    %c0_i32 = arith.constant 0 : i32
    %0 = arith.cmpi eq, %arg1, %c0_i32 : i32
    %1 = arith.extui %0 : i1 to i32
    %c0_i32_0 = arith.constant 0 : i32
    %2 = arith.cmpi ne, %1, %c0_i32_0 : i32
    scf.if %2 {
      %cst_10 = arith.constant 0.000000e+00 : f32
      %12 = vector.broadcast %cst_10 : f32 to vector<16x128xf32>
      %c0_11 = arith.constant 0 : index
      %c0_12 = arith.constant 0 : index
      %13 = vector.load %arg8[%c0_11, %c0_12] : memref<16x128xf32, #tpu.memory_space<vmem>>, vector<16x128xf32>
      tpu.vector_store %arg8[%c0_11, %c0_12], %12 {strides = array<i32>} : memref<16x128xf32, #tpu.memory_space<vmem>>, vector<16x128xf32>,
    } else {
    }
    %c0 = arith.constant 0 : index
    %c0_1 = arith.constant 0 : index
    %3 = vector.load %arg8[%c0, %c0_1] : memref<16x128xf32, #tpu.memory_space<vmem>>, vector<16x128xf32>
    %c0_2 = arith.constant 0 : index
    %c0_3 = arith.constant 0 : index
    %4 = vector.load %arg2[%c0_2, %c0_3] : memref<16x64xbf16, #tpu.memory_space<vmem>>, vector<16x64xbf16>
    %c0_4 = arith.constant 0 : index
    %c0_5 = arith.constant 0 : index
    %5 = vector.load %arg3[%c0_4, %c0_5] : memref<64x128xbf16, #tpu.memory_space<vmem>>, vector<64x128xbf16>
    %cst = arith.constant dense<0.000000e+00> : vector<16x128xf32>
    %6 = tpu.matmul %4, %5, %cst {dimension_numbers = #tpu.dot_dimension_numbers<[1], [0], [0], [1], [0, 0, 1, 1], [], []>} : vector<16x64xbf16>, vector<64x128xbf16>, vector<16x128xf32> -> vector<16x128xf32>
    %7 = arith.addf %3, %6 : vector<16x128xf32>
    %c0_6 = arith.constant 0 : index
    %c0_7 = arith.constant 0 : index
    %8 = vector.load %arg8[%c0_6, %c0_7] : memref<16x128xf32, #tpu.memory_space<vmem>>, vector<16x128xf32>
    tpu.vector_store %arg8[%c0_6, %c0_7], %7 {strides = array<i32>} : memref<16x128xf32, #tpu.memory_space<vmem>>, vector<16x128xf32>,
    %c0_i32_8 = arith.constant 0 : i32
    %9 = arith.cmpi eq, %arg1, %c0_i32_8 : i32
    %10 = arith.extui %9 : i1 to i32
    %c0_i32_9 = arith.constant 0 : i32
    %11 = arith.cmpi ne, %10, %c0_i32_9 : i32
    scf.if %11 {
      %c0_10 = arith.constant 0 : index
      %c0_11 = arith.constant 0 : index
      %12 = vector.load %arg8[%c0_10, %c0_11] : memref<16x128xf32, #tpu.memory_space<vmem>>, vector<16x128xf32>
      %c0_12 = arith.constant 0 : index
      %c0_13 = arith.constant 0 : index
      %13 = vector.load %arg4[%c0_12, %c0_13] : memref<1x128xf32, #tpu.memory_space<vmem>>, vector<1x128xf32>
      %14 = vector.broadcast %13 : vector<1x128xf32> to vector<16x128xf32>
      %15 = arith.addf %12, %14 : vector<16x128xf32>
      %cst_14 = arith.constant 0.000000e+00 : f32
      %16 = vector.broadcast %cst_14 : f32 to vector<16x128xf32>
      %17 = arith.maximumf %15, %16 : vector<16x128xf32>
      %18 = arith.truncf %17 : vector<16x128xf32> to vector<16x128xbf16>
      %c0_15 = arith.constant 0 : index
      %c0_16 = arith.constant 0 : index
      %19 = vector.load %arg5[%c0_15, %c0_16] : memref<128x128xbf16, #tpu.memory_space<vmem>>, vector<128x128xbf16>
      %cst_17 = arith.constant dense<0.000000e+00> : vector<16x128xf32>
      %20 = tpu.matmul %18, %19, %cst_17 {dimension_numbers = #tpu.dot_dimension_numbers<[1], [0], [0], [1], [0, 0, 1, 1], [], []>} : vector<16x128xbf16>, vector<128x128xbf16>, vector<16x128xf32> -> vector<16x128xf32>
      %c0_18 = arith.constant 0 : index
      %c0_19 = arith.constant 0 : index
      %21 = vector.load %arg6[%c0_18, %c0_19] : memref<1x128xf32, #tpu.memory_space<vmem>>, vector<1x128xf32>
      %22 = vector.broadcast %21 : vector<1x128xf32> to vector<16x128xf32>
      %23 = arith.addf %20, %22 : vector<16x128xf32>
      %cst_20 = arith.constant 0.000000e+00 : f32
      %24 = vector.broadcast %cst_20 : f32 to vector<16x128xf32>
      %25 = arith.maximumf %23, %24 : vector<16x128xf32>
      %c0_21 = arith.constant 0 : index
      %c0_22 = arith.constant 0 : index
      %26 = vector.load %arg7[%c0_21, %c0_22] : memref<16x128xf32, #tpu.memory_space<vmem>>, vector<16x128xf32>
      tpu.vector_store %arg7[%c0_21, %c0_22], %25 {strides = array<i32>} : memref<16x128xf32, #tpu.memory_space<vmem>>, vector<16x128xf32>,
    } else {
    }
    return
  }
  func.func @transform_0(%arg0: i32, %arg1: i32) -> (i32, i32) {
    %c0_i32 = arith.constant 0 : i32
    return %arg0, %arg1 : i32, i32
  }
  func.func @transform_1(%arg0: i32, %arg1: i32) -> (i32, i32) {
    %c0_i32 = arith.constant 0 : i32
    %c0_i32_0 = arith.constant 0 : i32
    return %arg1, %c0_i32 : i32, i32
  }
  func.func @transform_2(%arg0: i32, %arg1: i32) -> (i32, i32) {
    %c0_i32 = arith.constant 0 : i32
    %c0_i32_0 = arith.constant 0 : i32
    %c0_i32_1 = arith.constant 0 : i32
    return %c0_i32, %c0_i32_0 : i32, i32
  }
  func.func @transform_3(%arg0: i32, %arg1: i32) -> (i32, i32) {
    %c0_i32 = arith.constant 0 : i32
    %c0_i32_0 = arith.constant 0 : i32
    %c0_i32_1 = arith.constant 0 : i32
    return %c0_i32, %c0_i32_0 : i32, i32
  }
  func.func @transform_4(%arg0: i32, %arg1: i32) -> (i32, i32) {
    %c0_i32 = arith.constant 0 : i32
    %c0_i32_0 = arith.constant 0 : i32
    %c0_i32_1 = arith.constant 0 : i32
    return %c0_i32, %c0_i32_0 : i32, i32
  }
  func.func @transform_5(%arg0: i32, %arg1: i32) -> (i32, i32) {
    %c0_i32 = arith.constant 0 : i32
    %c0_i32_0 = arith.constant 0 : i32
    return %arg0, %c0_i32 : i32, i32
  }
}

</mosaic_0001>

<bundles_post_ra>
// kernel: tpu_custom_call.1
= control target key start
LH: loop header
LB: loop body
LE: loop exit
PB: predicated region body
PF: predicated region fallthrough
CT: control target
= control target key end

     0   :  { %10 = vsyncpa [#allocation4], 0  ;;  %s539_s0 = inlined_call_operand.hbm [shape: bf16[8,64], index: 0, kind: input, shape index: {}]   ;;  %s540_s1 = inlined_call_operand.hbm [shape: bf16[64,128], index: 1, kind: input, shape index: {}]   ;;  %s541_s2 = inlined_call_operand.vmem [shape: f32[1,128], index: 2, kind: input, shape index: {}]   ;;  %s542_s3 = inlined_call_operand.hbm [shape: bf16[128,128], index: 3, kind: input, shape index: {}]   ;;  %s543_s4 = inlined_call_operand.vmem [shape: f32[1,128], index: 4, kind: input, shape index: {}]   ;;  %s544_s5 = inlined_call_operand.hbm [shape: f32[8,128], index: 5, kind: output, shape index: {}]  }
   0x1   :  { %11 = vsyncpa [#allocation7], 0 }
   0x2   :  { %12 = vsyncpa [#allocation5], 0 }
   0x3   :  { %17 = vsyncadd [#allocation4], 64  ;;  %s481_s18 = smov [#allocation6]   ;;  %s482_s20 = smov [#allocation3]  }
   0x4   :  { %s30_s19 = sshll.u32 %s481_s18, 4  ;;  %s18_s21 = sshll.u32 %s482_s20, 4  ;;  %s31_s19 = int_to_ptr.vmem [resolvable:$true] %s30_s19  ;;  %s19_s21 = int_to_ptr.vmem [resolvable:$true] %s18_s21 }
   0x5   :  { %s403_s22 = scalar_lea.vmem %s31_s19, 512  ;;  %p408_p1 = scmp.lt.s32.totalorder %s31_s19, %s31_s19 }
   0x6   :  { %p404_p0 = scmp.ne.s32.totalorder %s31_s19, %s403_s22  ;;  %p409_p2 = scmp.lt.s32.totalorder %s403_s22, %s403_s22 }
   0x8   :  { %p410_p3 = por %p409_p2, %p408_p1 }
   0xa   :  { %p411_p4 = pnand %p410_p3, %p404_p0 }
   0xc   :  { %414 = shalt.err (!%p411_p4)
}
   0xd   :  { %s483_s23 = smov 64   ;;  %s484_s24 = smov 4  }
   0xe   :  { %36 = dma.hbm_to_vmem [thread:$0]  %s540_s1, 512, %s31_s19, [#allocation7], %s483_s23, %s483_s23, %s484_s24  }
   0xf   :  { %s423_s27 = scalar_lea.vmem %s19_s21, 64  ;;  %s427_s28 = scalar_lea.vmem %s19_s21, 128 }
  0x10   :  { %p424_p5 = scmp.ne.s32.totalorder %s19_s21, %s423_s27  ;;  %p428_p6 = scmp.lt.s32.totalorder %s19_s21, %s19_s21 }
  0x11   :  { %p429_p7 = scmp.lt.s32.totalorder %s427_s28, %s423_s27 }
  0x13   :  { %p430_p8 = por %p429_p7, %p428_p6 }
  0x15   :  { %p431_p9 = pnand %p430_p8, %p424_p5 }
  0x17   :  { %434 = shalt.err (!%p431_p9)
}
  0x18   :  { %24 = dma.hbm_to_vmem [thread:$0]  %s539_s0, 64, %s19_s21, [#allocation4], %s483_s23, %s483_s23, %s484_s24  }
  0x19   :  { %s485_s6 = smov [#allocation8]  }
  0x1a   :  { %s44_s7 = sshll.u32 %s485_s6, 4  ;;  %s45_s7 = int_to_ptr.vmem [resolvable:$true] %s44_s7 }
  0x1b   :  { %s443_s8 = scalar_lea.vmem %s45_s7, 1024  ;;  %p448_p11 = scmp.lt.s32.totalorder %s45_s7, %s45_s7 }
  0x1c   :  { %p444_p10 = scmp.ne.s32.totalorder %s45_s7, %s443_s8  ;;  %p449_p12 = scmp.lt.s32.totalorder %s443_s8, %s443_s8 }
  0x1e   :  { %p450_p13 = por %p449_p12, %p448_p11 }
  0x20   :  { %p451_p0 = pnand %p450_p13, %p444_p10 }
  0x22   :  { %454 = shalt.err (!%p451_p0)
}
  0x23   :  { %50 = dma.hbm_to_vmem [thread:$0]  %s542_s3, 1024, %s45_s7, [#allocation7], %s483_s23, %s483_s23, %s484_s24  }
  0x24   :  { %475 = dma.done.wait [#allocation4], 128  }
  0x25   :  { %476 = vsyncadd [#allocation4], 4294967168 }
  0x26   :  { %477 = dma.done.wait [#allocation7], 1536  }
  0x27   :  { %478 = vsyncadd [#allocation7], 4294965760  ;;  %v486_v0 = vmov 0.0   ;;  %vm487_vm0 = vmmov 0   ;;  %v382_v1 = vld [vmem:[#allocation6 + $0x18] sm:$0xff]   ;;  %v383_v2 = vld [vmem:[#allocation6 + $0x10] sm:$0xff]  }
  0x28   :  { %340 = vmatprep.subr.bf16.mxu0 %v486_v0  ;;  %348 = vmatprep.mubr.msk.bf16.mxu0 %vm487_vm0, %v486_v0  ;;  %v387_v3 = vld [vmem:[#allocation8 + $0x38] sm:$0xff]   ;;  %v384_v4 = vld [vmem:[#allocation6 + $0x8] sm:$0xff]   ;;  %v388_v5 = vld [vmem:[#allocation8 + $0x30] sm:$0xff]   ;;  %vm110_vm1 = vcmask 523264  }
  0x29   :  { %352 = vmatprep.subr.bf16.mxu1 %v486_v0  ;;  %368 = vmatprep.mubr.msk.bf16.mxu1 %vm487_vm0, %v486_v0  ;;  %v385_v6 = vld [vmem:[#allocation6] sm:$0xff]   ;;  %v389_v7 = vld [vmem:[#allocation8 + $0x28] sm:$0xff]   ;;  %v386_v8 = vld [vmem:[#allocation3] sm:$0xff]  }
  0x2a   :  { %341 = vmatpush3.bf16.msra.mxu0 %v382_v1  ;;  %353 = vmatpush3.bf16.msra.mxu1 %v387_v3  ;;  %v390_v9 = vld [vmem:[#allocation8 + $0x20] sm:$0xff]   ;;  %v391_v10 = vld [vmem:[#allocation8 + $0x18] sm:$0xff]   ;;  %v392_v11 = vld [vmem:[#allocation8 + $0x10] sm:$0xff]  }
  0x2b   :  { %342 = vmatprep.subr.bf16.mxu0 %v486_v0  ;;  %354 = vmatprep.subr.bf16.mxu1 %v486_v0  ;;  %v393_v12 = vld [vmem:[#allocation8 + $0x8] sm:$0xff]   ;;  %v394_v13 = vld [vmem:[#allocation8] sm:$0xff]   ;;  %v316_v15 = vld [vmem:[%s541_s2] ss:$0 sm:$0xff] }
  0x2c   :  { %v317_v24 = vld [vmem:[%s543_s4] ss:$0 sm:$0xff] }
  0x2e   :  { %343 = vmatpush3.bf16.msra.mxu0 %v383_v2  ;;  %355 = vmatpush3.bf16.msra.mxu1 %v388_v5 }
  0x2f   :  { %344 = vmatprep.subr.bf16.mxu0 %v486_v0  ;;  %356 = vmatprep.subr.bf16.mxu1 %v486_v0 }
  0x32   :  { %345 = vmatpush3.bf16.msra.mxu0 %v384_v4  ;;  %357 = vmatpush3.bf16.msra.mxu1 %v389_v7 }
  0x33   :  { %346 = vmatprep.subr.bf16.mxu0 %v486_v0  ;;  %358 = vmatprep.subr.bf16.mxu1 %v486_v0 }
  0x36   :  { %347 = vmatpush3.bf16.msra.mxu0 %v385_v6  ;;  %359 = vmatpush3.bf16.msra.mxu1 %v390_v9 }
  0x37   :  { %360 = vmatprep.subr.bf16.mxu1 %v486_v0 }
  0x39   :  { %349 = vmatmul.mubr.msk.bf16.vlgmr.msra.gmra.mxu0 %vm110_vm1, %v386_v8 }
  0x3a   :  { %361 = vmatpush3.bf16.msra.mxu1 %v391_v10 }
  0x3b   :  { %362 = vmatprep.subr.bf16.mxu1 %v486_v0 }
  0x3e   :  { %363 = vmatpush3.bf16.msra.mxu1 %v392_v11 }
  0x3f   :  { %364 = vmatprep.subr.bf16.mxu1 %v486_v0 }
  0x42   :  { %365 = vmatpush3.bf16.msra.mxu1 %v393_v12 }
  0x43   :  { %366 = vmatprep.subr.bf16.mxu1 %v486_v0 }
  0x46   :  { %367 = vmatpush3.bf16.msra.mxu1 %v394_v13 }
  0xf9   :  { %v148_v14 = vpop.f32.mrf.mxu0 }
  0xfa   :  { %v171_v17 = vadd.f32 %v316_v15, %v148_v14 }
  0xfb   :  { %v350_v16 = vpop.f32.mrf.mxu0 }
  0xfc   :  { %v173_v21 = vmax.f32 %v171_v17, 0.0 }
  0xfd   :  { %v151_v18 = vpop.f32.mrf.mxu0 }
  0xfe   :  { %v172_v19 = vadd.f32 %v316_v15, %v151_v18 }
  0xff   :  { %v351_v20 = vpop.f32.mrf.mxu0 }
 0x100   :  { %v174_v22 = vmax.f32 %v172_v19, 0.0 }
 0x102   :  { %v175_v23 = vpack.c.bf16 %v174_v22, %v173_v21 }
 0x104   :  { %369 = vmatmul.mubr.bf16.vlgmr.msra.gmra.mxu1 %v175_v23 }
 0x1c4   :  { %v281_v25 = vpop.f32.mrf.mxu1 }
 0x1c5   :  { %v282_v26 = vadd.f32 %v317_v24, %v281_v25 }
 0x1c6   :  { %v370_v27 = vpop.f32.mrf.mxu1 }
 0x1c7   :  { %v288_v28 = vmax.f32 %v282_v26, 0.0 }
 0x1c8   :  { %v284_v29 = vpop.f32.mrf.mxu1 }
 0x1c9   :  { %290 = vst [vmem:[#allocation9] sm:$0xff] %v288_v28  ;;  %v285_v30 = vadd.f32 %v317_v24, %v284_v29 }
 0x1ca   :  { %v371_v31 = vpop.f32.mrf.mxu1 }
 0x1cb   :  { %v289_v32 = vmax.f32 %v285_v30, 0.0 }
 0x1cd   :  { %291 = vst [vmem:[#allocation9 + $0x8] sm:$0xff] %v289_v32 }
 0x1ce   :  { %296 = vsyncadd [#allocation5], 128  ;;  %s488_s2 = smov [#allocation9]  }
 0x1cf   :  { %s297_s12 = sshll.u32 %s488_s2, 4  ;;  %s298_s12 = int_to_ptr.vmem [resolvable:$true] %s297_s12 }
 0x1d0   :  { %s455_s13 = scalar_lea.vmem %s298_s12, 128  ;;  %s459_s14 = scalar_lea.vmem %s298_s12, 256 }
 0x1d1   :  { %p456_p1 = scmp.ne.s32.totalorder %s298_s12, %s455_s13  ;;  %p460_p2 = scmp.lt.s32.totalorder %s298_s12, %s298_s12 }
 0x1d2   :  { %p461_p3 = scmp.lt.s32.totalorder %s459_s14, %s455_s13 }
 0x1d4   :  { %p462_p4 = por %p461_p3, %p460_p2 }
 0x1d6   :  { %p463_p5 = pnand %p462_p4, %p456_p1 }
 0x1d8   :  { %466 = shalt.err (!%p463_p5)
}
 0x1d9   :  { %s489_s4 = smov 128   ;;  %s490_s15 = smov 8  }
 0x1da   :  { %303 = dma.vmem_to_hbm [thread:$0]  %s298_s12, 128, %s544_s5, [#allocation5], %s489_s4, %s489_s4, %s490_s15  }
 0x1db   :  { %479 = dma.done.wait [#allocation5], 256  }
 0x1dc   :  { %480 = vsyncadd [#allocation5], 4294967040 }
 0x1dd   :  { %307 = vsyncpa [#allocation4], 1 }
 0x1de   :  { %308 = vsyncpa [#allocation7], 1 }
 0x1df   :  { %309 = vsyncpa [#allocation5], 1 }

// kernel: tpu_custom_call.1
= control target key start
LH: loop header
LB: loop body
LE: loop exit
PB: predicated region body
PF: predicated region fallthrough
CT: control target
= control target key end

     0   :  { %10 = vsyncpa [#allocation4], 0  ;;  %s539_s0 = inlined_call_operand.hbm [shape: bf16[8,64], index: 0, kind: input, shape index: {}]   ;;  %s540_s1 = inlined_call_operand.hbm [shape: bf16[64,128], index: 1, kind: input, shape index: {}]   ;;  %s541_s2 = inlined_call_operand.vmem [shape: f32[1,128], index: 2, kind: input, shape index: {}]   ;;  %s542_s3 = inlined_call_operand.hbm [shape: bf16[128,128], index: 3, kind: input, shape index: {}]   ;;  %s543_s4 = inlined_call_operand.vmem [shape: f32[1,128], index: 4, kind: input, shape index: {}]   ;;  %s544_s5 = inlined_call_operand.hbm [shape: f32[8,128], index: 5, kind: output, shape index: {}]  }
   0x1   :  { %11 = vsyncpa [#allocation7], 0 }
   0x2   :  { %12 = vsyncpa [#allocation5], 0 }
   0x3   :  { %17 = vsyncadd [#allocation4], 64  ;;  %s481_s18 = smov [#allocation6]   ;;  %s482_s20 = smov [#allocation3]  }
   0x4   :  { %s30_s19 = sshll.u32 %s481_s18, 4  ;;  %s18_s21 = sshll.u32 %s482_s20, 4  ;;  %s31_s19 = int_to_ptr.vmem [resolvable:$true] %s30_s19  ;;  %s19_s21 = int_to_ptr.vmem [resolvable:$true] %s18_s21 }
   0x5   :  { %s403_s22 = scalar_lea.vmem %s31_s19, 512  ;;  %p408_p1 = scmp.lt.s32.totalorder %s31_s19, %s31_s19 }
   0x6   :  { %p404_p0 = scmp.ne.s32.totalorder %s31_s19, %s403_s22  ;;  %p409_p2 = scmp.lt.s32.totalorder %s403_s22, %s403_s22 }
   0x8   :  { %p410_p3 = por %p409_p2, %p408_p1 }
   0xa   :  { %p411_p4 = pnand %p410_p3, %p404_p0 }
   0xc   :  { %414 = shalt.err (!%p411_p4)
}
   0xd   :  { %s483_s23 = smov 64   ;;  %s484_s24 = smov 4  }
   0xe   :  { %36 = dma.hbm_to_vmem [thread:$0]  %s540_s1, 512, %s31_s19, [#allocation7], %s483_s23, %s483_s23, %s484_s24  }
   0xf   :  { %s423_s27 = scalar_lea.vmem %s19_s21, 64  ;;  %s427_s28 = scalar_lea.vmem %s19_s21, 128 }
  0x10   :  { %p424_p5 = scmp.ne.s32.totalorder %s19_s21, %s423_s27  ;;  %p428_p6 = scmp.lt.s32.totalorder %s19_s21, %s19_s21 }
  0x11   :  { %p429_p7 = scmp.lt.s32.totalorder %s427_s28, %s423_s27 }
  0x13   :  { %p430_p8 = por %p429_p7, %p428_p6 }
  0x15   :  { %p431_p9 = pnand %p430_p8, %p424_p5 }
  0x17   :  { %434 = shalt.err (!%p431_p9)
}
  0x18   :  { %24 = dma.hbm_to_vmem [thread:$0]  %s539_s0, 64, %s19_s21, [#allocation4], %s483_s23, %s483_s23, %s484_s24  }
  0x19   :  { %s485_s6 = smov [#allocation8]  }
  0x1a   :  { %s44_s7 = sshll.u32 %s485_s6, 4  ;;  %s45_s7 = int_to_ptr.vmem [resolvable:$true] %s44_s7 }
  0x1b   :  { %s443_s8 = scalar_lea.vmem %s45_s7, 1024  ;;  %p448_p11 = scmp.lt.s32.totalorder %s45_s7, %s45_s7 }
  0x1c   :  { %p444_p10 = scmp.ne.s32.totalorder %s45_s7, %s443_s8  ;;  %p449_p12 = scmp.lt.s32.totalorder %s443_s8, %s443_s8 }
  0x1e   :  { %p450_p13 = por %p449_p12, %p448_p11 }
  0x20   :  { %p451_p0 = pnand %p450_p13, %p444_p10 }
  0x22   :  { %454 = shalt.err (!%p451_p0)
}
  0x23   :  { %50 = dma.hbm_to_vmem [thread:$0]  %s542_s3, 1024, %s45_s7, [#allocation7], %s483_s23, %s483_s23, %s484_s24  }
  0x24   :  { %475 = dma.done.wait [#allocation4], 128  }
  0x25   :  { %476 = vsyncadd [#allocation4], 4294967168 }
  0x26   :  { %477 = dma.done.wait [#allocation7], 1536  }
  0x27   :  { %478 = vsyncadd [#allocation7], 4294965760  ;;  %v486_v0 = vmov 0.0   ;;  %vm487_vm0 = vmmov 0   ;;  %v382_v1 = vld [vmem:[#allocation6 + $0x18] sm:$0xff]   ;;  %v383_v2 = vld [vmem:[#allocation6 + $0x10] sm:$0xff]  }
  0x28   :  { %340 = vmatprep.subr.bf16.mxu0 %v486_v0  ;;  %348 = vmatprep.mubr.msk.bf16.mxu0 %vm487_vm0, %v486_v0  ;;  %v387_v3 = vld [vmem:[#allocation8 + $0x38] sm:$0xff]   ;;  %v384_v4 = vld [vmem:[#allocation6 + $0x8] sm:$0xff]   ;;  %v388_v5 = vld [vmem:[#allocation8 + $0x30] sm:$0xff]   ;;  %vm110_vm1 = vcmask 523264  }
  0x29   :  { %352 = vmatprep.subr.bf16.mxu1 %v486_v0  ;;  %368 = vmatprep.mubr.msk.bf16.mxu1 %vm487_vm0, %v486_v0  ;;  %v385_v6 = vld [vmem:[#allocation6] sm:$0xff]   ;;  %v389_v7 = vld [vmem:[#allocation8 + $0x28] sm:$0xff]   ;;  %v386_v8 = vld [vmem:[#allocation3] sm:$0xff]  }
  0x2a   :  { %341 = vmatpush3.bf16.msra.mxu0 %v382_v1  ;;  %353 = vmatpush3.bf16.msra.mxu1 %v387_v3  ;;  %v390_v9 = vld [vmem:[#allocation8 + $0x20] sm:$0xff]   ;;  %v391_v10 = vld [vmem:[#allocation8 + $0x18] sm:$0xff]   ;;  %v392_v11 = vld [vmem:[#allocation8 + $0x10] sm:$0xff]  }
  0x2b   :  { %342 = vmatprep.subr.bf16.mxu0 %v486_v0  ;;  %354 = vmatprep.subr.bf16.mxu1 %v486_v0  ;;  %v393_v12 = vld [vmem:[#allocation8 + $0x8] sm:$0xff]   ;;  %v394_v13 = vld [vmem:[#allocation8] sm:$0xff]   ;;  %v316_v15 = vld [vmem:[%s541_s2] ss:$0 sm:$0xff] }
  0x2c   :  { %v317_v24 = vld [vmem:[%s543_s4] ss:$0 sm:$0xff] }
  0x2e   :  { %343 = vmatpush3.bf16.msra.mxu0 %v383_v2  ;;  %355 = vmatpush3.bf16.msra.mxu1 %v388_v5 }
  0x2f   :  { %344 = vmatprep.subr.bf16.mxu0 %v486_v0  ;;  %356 = vmatprep.subr.bf16.mxu1 %v486_v0 }
  0x32   :  { %345 = vmatpush3.bf16.msra.mxu0 %v384_v4  ;;  %357 = vmatpush3.bf16.msra.mxu1 %v389_v7 }
  0x33   :  { %346 = vmatprep.subr.bf16.mxu0 %v486_v0  ;;  %358 = vmatprep.subr.bf16.mxu1 %v486_v0 }
  0x36   :  { %347 = vmatpush3.bf16.msra.mxu0 %v385_v6  ;;  %359 = vmatpush3.bf16.msra.mxu1 %v390_v9 }
  0x37   :  { %360 = vmatprep.subr.bf16.mxu1 %v486_v0 }
  0x39   :  { %349 = vmatmul.mubr.msk.bf16.vlgmr.msra.gmra.mxu0 %vm110_vm1, %v386_v8 }
  0x3a   :  { %361 = vmatpush3.bf16.msra.mxu1 %v391_v10 }
  0x3b   :  { %362 = vmatprep.subr.bf16.mxu1 %v486_v0 }
  0x3e   :  { %363 = vmatpush3.bf16.msra.mxu1 %v392_v11 }
  0x3f   :  { %364 = vmatprep.subr.bf16.mxu1 %v486_v0 }
  0x42   :  { %365 = vmatpush3.bf16.msra.mxu1 %v393_v12 }
  0x43   :  { %366 = vmatprep.subr.bf16.mxu1 %v486_v0 }
  0x46   :  { %367 = vmatpush3.bf16.msra.mxu1 %v394_v13 }
  0xf9   :  { %v148_v14 = vpop.f32.mrf.mxu0 }
  0xfa   :  { %v171_v17 = vadd.f32 %v316_v15, %v148_v14 }
  0xfb   :  { %v350_v16 = vpop.f32.mrf.mxu0 }
  0xfc   :  { %v173_v21 = vmax.f32 %v171_v17, 0.0 }
  0xfd   :  { %v151_v18 = vpop.f32.mrf.mxu0 }
  0xfe   :  { %v172_v19 = vadd.f32 %v316_v15, %v151_v18 }
  0xff   :  { %v351_v20 = vpop.f32.mrf.mxu0 }
 0x100   :  { %v174_v22 = vmax.f32 %v172_v19, 0.0 }
 0x102   :  { %v175_v23 = vpack.c.bf16 %v174_v22, %v173_v21 }
 0x104   :  { %369 = vmatmul.mubr.bf16.vlgmr.msra.gmra.mxu1 %v175_v23 }
 0x1c4   :  { %v281_v25 = vpop.f32.mrf.mxu1 }
 0x1c5   :  { %v282_v26 = vadd.f32 %v317_v24, %v281_v25 }
 0x1c6   :  { %v370_v27 = vpop.f32.mrf.mxu1 }
 0x1c7   :  { %v288_v28 = vmax.f32 %v282_v26, 0.0 }
 0x1c8   :  { %v284_v29 = vpop.f32.mrf.mxu1 }
 0x1c9   :  { %290 = vst [vmem:[#allocation9] sm:$0xff] %v288_v28  ;;  %v285_v30 = vadd.f32 %v317_v24, %v284_v29 }
 0x1ca   :  { %v371_v31 = vpop.f32.mrf.mxu1 }
 0x1cb   :  { %v289_v32 = vmax.f32 %v285_v30, 0.0 }
 0x1cd   :  { %291 = vst [vmem:[#allocation9 + $0x8] sm:$0xff] %v289_v32 }
 0x1ce   :  { %296 = vsyncadd [#allocation5], 128  ;;  %s488_s2 = smov [#allocation9]  }
 0x1cf   :  { %s297_s12 = sshll.u32 %s488_s2, 4  ;;  %s298_s12 = int_to_ptr.vmem [resolvable:$true] %s297_s12 }
 0x1d0   :  { %s455_s13 = scalar_lea.vmem %s298_s12, 128  ;;  %s459_s14 = scalar_lea.vmem %s298_s12, 256 }
 0x1d1   :  { %p456_p1 = scmp.ne.s32.totalorder %s298_s12, %s455_s13  ;;  %p460_p2 = scmp.lt.s32.totalorder %s298_s12, %s298_s12 }
 0x1d2   :  { %p461_p3 = scmp.lt.s32.totalorder %s459_s14, %s455_s13 }
 0x1d4   :  { %p462_p4 = por %p461_p3, %p460_p2 }
 0x1d6   :  { %p463_p5 = pnand %p462_p4, %p456_p1 }
 0x1d8   :  { %466 = shalt.err (!%p463_p5)
}
 0x1d9   :  { %s489_s4 = smov 128   ;;  %s490_s15 = smov 8  }
 0x1da   :  { %303 = dma.vmem_to_hbm [thread:$0]  %s298_s12, 128, %s544_s5, [#allocation5], %s489_s4, %s489_s4, %s490_s15  }
 0x1db   :  { %479 = dma.done.wait [#allocation5], 256  }
 0x1dc   :  { %480 = vsyncadd [#allocation5], 4294967040 }
 0x1dd   :  { %307 = vsyncpa [#allocation4], 1 }
 0x1de   :  { %308 = vsyncpa [#allocation7], 1 }
 0x1df   :  { %309 = vsyncpa [#allocation5], 1 }

</bundles_post_ra>
